<compile_context>
chip_gen: v5e
topology: v5e:2x2
jax: 0.10.0
libtpu: 0.0.40
codegen_flags: <defaults>
</compile_context>

<pallas_src>
import functools

import jax
import jax.numpy as jnp
from jax.experimental import pallas as pl
from jax.experimental.pallas import tpu as pltpu


def _round_up(n, m):
    return ((n + m - 1) // m) * m


_VMEM_LIMIT = 32 * 1024 * 1024  # safe on v5e/v6e (128 MiB) and v7x (64 MiB)


# ----------------------------------------------------------------------------
# Kernel 1: zero-pad a (B*C, D, H, W) volume by `pad` on every side of D/H/W.
#           Output dtype may differ (bf16) to halve the HBM round trip.
# ----------------------------------------------------------------------------
def _pad3d_kernel(x_ref, o_ref, *, pad):
    x = x_ref[...]                                       # (1, D, H, W) f32
    _, d, h, _ = x.shape
    _, dp, hp, wp = o_ref.shape
    # Build the padded block in registers and store it ONCE (single full store,
    # no second masked interior store).
    zw = jnp.zeros((1, d, h, pad), x.dtype)
    x = jnp.concatenate([zw, x, zw], axis=3)             # lane (W) placement
    zh = jnp.zeros((1, d, pad, wp), x.dtype)
    x = jnp.concatenate([zh, x, zh], axis=2)             # sublane (H) placement
    zd = jnp.zeros((1, pad, hp, wp), x.dtype)
    full = jnp.concatenate([zd, x, zd], axis=1)
    o_ref[...] = full.astype(o_ref.dtype)                # single full store


def pad3d(x, pad=2, out_dtype=None):
    """nnf.pad(x, (p,p,p,p,p,p)) on a (B*C, D, H, W) volume (Pallas)."""
    bc, d, h, w = x.shape
    dp, hp, wp = d + 2 * pad, h + 2 * pad, w + 2 * pad
    out_dtype = x.dtype if out_dtype is None else out_dtype
    return pl.pallas_call(
        functools.partial(_pad3d_kernel, pad=pad),
        out_shape=jax.ShapeDtypeStruct((bc, dp, hp, wp), out_dtype),
        grid=(bc,),
        in_specs=[pl.BlockSpec((1, d, h, w), lambda i: (i, 0, 0, 0))],
        out_specs=pl.BlockSpec((1, dp, hp, wp), lambda i: (i, 0, 0, 0)),
        compiler_params=pltpu.CompilerParams(
            dimension_semantics=("parallel",),
            vmem_limit_bytes=_VMEM_LIMIT),
    )(x)


# ----------------------------------------------------------------------------
# Kernel 2: fused synthetic-encoder + classifier head.
#   grid = (B, num_token_tiles); the token (reduction) axis is last.
#   Per step: patch-embed GEMM on one (tm, Kpad) patch tile (bf16 in / f32 acc
#   on the MXU); the column-sum of the token tile is accumulated in a VMEM
#   scratch (tokens never touch HBM).  At the last tile: mean-pool, add the
#   patch-embed bias + cls token, run the fc GEMM and store a lane-dense
#   (1, 1, Npad) logits slab.
# ----------------------------------------------------------------------------
def _encoder_head_kernel(patches_ref, wp_ref, wfc_ref, consts_ref,
                         out_ref, pool_ref, *, inv_np):
    m = pl.program_id(1)
    dpad = wp_ref.shape[1]
    npad = wfc_ref.shape[1]

    @pl.when(m == 0)
    def _init():
        pool_ref[...] = jnp.zeros_like(pool_ref)

    # Patch-embed GEMM: (tm, Kpad) bf16 @ (Kpad, Dpad) bf16 -> f32 tokens.
    tok = jnp.dot(patches_ref[0], wp_ref[...],
                  preferred_element_type=jnp.float32)            # (tm, Dpad)
    # Accumulate the pooled (column) sum; zero-padded tail patch rows add 0.
    pool_ref[...] += jnp.sum(tok, axis=0, keepdims=True)         # (1, Dpad) f32

    @pl.when(m == pl.num_programs(1) - 1)
    def _epilogue():
        # mean over the *real* patch count, then + patch-embed bias (f32 VPU).
        mean_tok = pool_ref[...] * inv_np + consts_ref[0:1, :dpad]
        cls_feat = consts_ref[1:2, :dpad] + mean_tok             # cls + pool
        logits = jnp.dot(cls_feat.astype(wfc_ref.dtype), wfc_ref[...],
                         preferred_element_type=jnp.float32)     # fc head (MXU)
        logits = logits + consts_ref[2:3, :npad]
        out_ref[...] = logits.reshape(out_ref.shape)


def fused_encoder_head(patches, w_patch, w_fc, consts, *, n_patches, tm):
    """patches: (B, Np_pad, Kpad) bf16; w_patch: (Kpad, Dpad) bf16;
    w_fc: (Dpad, Npad) bf16; consts: (8, Cw) f32 rows [b_patch, cls, b_fc].
    Returns a (B, 1, Npad) f32 lane-dense logits slab (crop outside)."""
    b, np_pad, kpad = patches.shape
    dpad = w_patch.shape[1]
    npad = w_fc.shape[1]
    cw = consts.shape[1]
    num_m = np_pad // tm
    return pl.pallas_call(
        functools.partial(_encoder_head_kernel, inv_np=1.0 / n_patches),
        out_shape=jax.ShapeDtypeStruct((b, 1, npad), jnp.float32),
        grid=(b, num_m),
        in_specs=[
            pl.BlockSpec((1, tm, kpad), lambda i, m: (i, m, 0)),
            pl.BlockSpec((kpad, dpad), lambda i, m: (0, 0)),   # resident weights
            pl.BlockSpec((dpad, npad), lambda i, m: (0, 0)),
            pl.BlockSpec((8, cw), lambda i, m: (0, 0)),
        ],
        out_specs=pl.BlockSpec((1, 1, npad), lambda i, m: (i, 0, 0)),
        scratch_shapes=[pltpu.VMEM((1, dpad), jnp.float32)],
        compiler_params=pltpu.CompilerParams(
            dimension_semantics=("parallel", "arbitrary"),
            vmem_limit_bytes=_VMEM_LIMIT),
    )(patches, w_patch, w_fc, consts)


# ----------------------------------------------------------------------------
# Glue (plain JAX): patch extraction + parameter setup
# ----------------------------------------------------------------------------
def patchify3d(x, p):
    """(B, C, D, H, W) -> (B, Np, C*p^3) with non-overlapping p^3 patches."""
    b, c, d, h, w = x.shape
    t = x.reshape(b, c, d // p, p, h // p, p, w // p, p)
    t = t.transpose(0, 2, 4, 6, 1, 3, 5, 7)
    return t.reshape(b, (d // p) * (h // p) * (w // p), c * p * p * p)


def _pick_tm(n_patches):
    if n_patches >= 512:
        return 512
    if n_patches >= 256:
        return 256
    return _round_up(n_patches, 16)


class SyntheticEncoder:
    """Deterministic stand-in for the external UniMiSS MiT encoder.

    Non-overlapping p^3 patch-embed matmul + bias; the cls feature is
    `cls_token + mean(patch tokens)`.  Weights are stored zero-padded to
    128-multiples (lane-dense / MXU-friendly) and in bf16 for the MXU;
    bias / cls stay f32 for the VPU epilogue.
    """

    def __init__(self, key, in_chans=1, patch=4, embed_dims=(16, 24, 32, 48)):
        self.embed_dims = embed_dims
        self.patch = patch
        self.in_chans = in_chans
        d = embed_dims[3]
        k = in_chans * patch ** 3
        self.d_model = d
        self.k = k
        self.k_pad = _round_up(k, 128)
        self.d_pad = _round_up(d, 128)
        k1, k2 = jax.random.split(key)
        w = jax.random.normal(k1, (k, d), jnp.float32) * 0.02
        cls = jax.random.normal(k2, (1, d), jnp.float32) * 0.02
        self.w_patch = jnp.pad(
            w, ((0, self.k_pad - k), (0, self.d_pad - d))).astype(jnp.bfloat16)
        self.b_patch = jnp.zeros((self.d_pad,), jnp.float32)
        self.cls_token = jnp.pad(cls, ((0, 0), (0, self.d_pad - d)))  # f32


class UniMiSSClassifierPallas:
    """Pallas implementation of UniMiSSClassifier.forward.

    forward(x): trilinear resize to 96^3 (interpolate) OR zero-pad by 2 (Pallas
    kernel), then encoder tokens -> cls token -> fc logits.  The encoder GEMM,
    cls pooling and the fc head run inside one fused pallas_call.
    """

    def __init__(self, encoder, n_classes, interpolate, key):
        self.encoder = encoder
        self.interpolate = interpolate
        self.n_classes = n_classes
        d, dpad = encoder.d_model, encoder.d_pad
        self.n_pad = _round_up(n_classes, 128)
        k1, _ = jax.random.split(key)
        w = jax.random.normal(k1, (d, n_classes), jnp.float32) * 0.02
        self.w_fc = jnp.pad(
            w, ((0, dpad - d), (0, self.n_pad - n_classes))).astype(jnp.bfloat16)
        self.b_fc = jnp.zeros((self.n_pad,), jnp.float32)
        # Pack the small f32 vectors into one sublane-aligned (8, Cw) block:
        # row 0 = patch-embed bias, row 1 = cls token, row 2 = fc bias.
        cw = max(dpad, self.n_pad)
        consts = jnp.zeros((8, cw), jnp.float32)
        consts = consts.at[0, :dpad].set(encoder.b_patch)
        consts = consts.at[1, :dpad].set(encoder.cls_token[0])
        consts = consts.at[2, :self.n_pad].set(self.b_fc)
        self.consts = consts

    def __call__(self, x):
        b, c, d, h, w = x.shape
        enc = self.encoder
        p = enc.patch
        if self.interpolate:
            # TODO(synk): trilinear resize kept as plain-JAX glue; antialias=False
            # matches PyTorch nnf.interpolate (no antialias on downsample).
            x = jax.image.resize(x, (b, c, 96, 96, 96), method='trilinear',
                                 antialias=False)
            x = x.astype(jnp.bfloat16)
        else:
            # Pallas pad kernel, emitted directly in bf16 (half HBM traffic).
            xp = pad3d(x.reshape(b * c, d, h, w), pad=2, out_dtype=jnp.bfloat16)
            x = xp.reshape(b, c, d + 4, h + 4, w + 4)

        # Patch extraction stays as one XLA reshape/transpose pass (bf16).
        # TODO(synk): gather patches (with the pad folded in) directly inside
        # the fused kernel via an index_map over the patch grid to remove this
        # remaining full-volume HBM round trip.
        patches = patchify3d(x, p)                           # (B, Np, K) bf16
        n_patches, k = patches.shape[1], patches.shape[2]
        tm = _pick_tm(n_patches)
        np_pad = _round_up(n_patches, tm)
        patches = jnp.pad(patches, ((0, 0), (0, np_pad - n_patches),
                                    (0, enc.k_pad - k)))     # bf16 zero-pad

        logits = fused_encoder_head(patches, enc.w_patch, self.w_fc,
                                    self.consts, n_patches=n_patches, tm=tm)
        return logits[:, 0, :self.n_classes]                 # crop padded lanes


# ----------------------------------------------------------------------------
def reference_forward(model, x):
    """Pure-JAX reference (same bf16 GEMM operands, f32 accumulation)."""
    enc = model.encoder
    b, c, _, _, _ = x.shape
    if model.interpolate:
        xr = jax.image.resize(x, (b, c, 96, 96, 96), method='trilinear',
                              antialias=False)
    else:
        xr = jnp.pad(x, ((0, 0), (0, 0), (2, 2), (2, 2), (2, 2)))
    patches = patchify3d(xr, enc.patch).astype(jnp.bfloat16)
    patches = jnp.pad(patches, ((0, 0), (0, 0),
                                (0, enc.k_pad - patches.shape[2])))
    tok = jnp.einsum('bnk,kd->bnd', patches, enc.w_patch,
                     preferred_element_type=jnp.float32) + enc.b_patch
    cls_feat = enc.cls_token[0] + jnp.mean(tok, axis=1)
    logits = jnp.einsum('bd,dn->bn', cls_feat.astype(jnp.bfloat16), model.w_fc,
                        preferred_element_type=jnp.float32) + model.b_fc
    return logits[:, :model.n_classes]


if __name__ == "__main__":
    key = jax.random.PRNGKey(0)
    k_enc, k_cls, k_x = jax.random.split(key, 3)

    B, C, S = 2, 1, 12          # padded to 16^3 -> 4^3 = 64 patches of size 4^3
    n_classes = 11

    encoder = SyntheticEncoder(k_enc, in_chans=C, patch=4,
                               embed_dims=(16, 24, 32, 48))
    model = UniMiSSClassifierPallas(encoder, n_classes=n_classes,
                                    interpolate=False, key=k_cls)

    x = jax.random.normal(k_x, (B, C, S, S, S), jnp.float32)

    logits = jax.jit(model.__call__)(x)
    logits = jax.block_until_ready(logits)
    assert logits.shape == (B, n_classes)
    assert logits.dtype == jnp.float32

    ref = reference_forward(model, x)
    assert jnp.allclose(logits, ref, rtol=1e-2, atol=5e-4), \
        float(jnp.max(jnp.abs(logits - ref)))
    print("KERNEL_OK")
</pallas_src>

<mosaic_0001>
module attributes {stable_mosaic.version = 11 : i64} {
  func.func @_pad3d_kernel(%arg0: i32, %arg1: memref<1x12x12x12xf32, #tpu.memory_space<vmem>>, %arg2: memref<1x16x16x16xbf16, #tpu.memory_space<vmem>>) attributes {dimension_semantics = [#tpu.dimension_semantics<parallel>], iteration_bounds = array<i64: 2>, scalar_prefetch = 0 : i64, scratch_operands = 0 : i64, tpu.core_type = #tpu.core_type<tc>, window_params = [{transform_indices = @transform_0, window_bounds = array<i64: 1, 12, 12, 12>}, {transform_indices = @transform_1, window_bounds = array<i64: 1, 16, 16, 16>}]} {
    %c0 = arith.constant 0 : index
    %c0_0 = arith.constant 0 : index
    %c0_1 = arith.constant 0 : index
    %c0_2 = arith.constant 0 : index
    %0 = vector.load %arg1[%c0, %c0_0, %c0_1, %c0_2] : memref<1x12x12x12xf32, #tpu.memory_space<vmem>>, vector<1x12x12x12xf32>
    %cst = arith.constant 0.000000e+00 : f32
    %1 = vector.broadcast %cst : f32 to vector<1x12x12x2xf32>
    %2 = tpu.concatenate %1, %0, %1 in 3 : vector<1x12x12x2xf32>, vector<1x12x12x12xf32>, vector<1x12x12x2xf32> -> vector<1x12x12x16xf32>
    %cst_3 = arith.constant 0.000000e+00 : f32
    %3 = vector.broadcast %cst_3 : f32 to vector<1x12x2x16xf32>
    %4 = tpu.concatenate %3, %2, %3 in 2 : vector<1x12x2x16xf32>, vector<1x12x12x16xf32>, vector<1x12x2x16xf32> -> vector<1x12x16x16xf32>
    %cst_4 = arith.constant 0.000000e+00 : f32
    %5 = vector.broadcast %cst_4 : f32 to vector<1x2x16x16xf32>
    %6 = tpu.concatenate %5, %4, %5 in 1 : vector<1x2x16x16xf32>, vector<1x12x16x16xf32>, vector<1x2x16x16xf32> -> vector<1x16x16x16xf32>
    %7 = arith.truncf %6 : vector<1x16x16x16xf32> to vector<1x16x16x16xbf16>
    %c0_5 = arith.constant 0 : index
    %c0_6 = arith.constant 0 : index
    %c0_7 = arith.constant 0 : index
    %c0_8 = arith.constant 0 : index
    %8 = vector.load %arg2[%c0_5, %c0_6, %c0_7, %c0_8] : memref<1x16x16x16xbf16, #tpu.memory_space<vmem>>, vector<1x16x16x16xbf16>
    tpu.vector_store %arg2[%c0_5, %c0_6, %c0_7, %c0_8], %7 {strides = array<i32>} : memref<1x16x16x16xbf16, #tpu.memory_space<vmem>>, vector<1x16x16x16xbf16>,
    return
  }
  func.func @transform_0(%arg0: i32) -> (i32, i32, i32, i32) {
    %c0_i32 = arith.constant 0 : i32
    %c0_i32_0 = arith.constant 0 : i32
    %c0_i32_1 = arith.constant 0 : i32
    %c0_i32_2 = arith.constant 0 : i32
    return %arg0, %c0_i32, %c0_i32_0, %c0_i32_1 : i32, i32, i32, i32
  }
  func.func @transform_1(%arg0: i32) -> (i32, i32, i32, i32) {
    %c0_i32 = arith.constant 0 : i32
    %c0_i32_0 = arith.constant 0 : i32
    %c0_i32_1 = arith.constant 0 : i32
    %c0_i32_2 = arith.constant 0 : i32
    return %arg0, %c0_i32, %c0_i32_0, %c0_i32_1 : i32, i32, i32, i32
  }
}

module attributes {stable_mosaic.version = 11 : i64} {
  func.func @_encoder_head_kernel(%arg0: i32, %arg1: i32, %arg2: memref<1x64x128xbf16, #tpu.memory_space<vmem>>, %arg3: memref<128x128xbf16, #tpu.memory_space<vmem>>, %arg4: memref<128x128xbf16, #tpu.memory_space<vmem>>, %arg5: memref<8x128xf32, #tpu.memory_space<vmem>>, %arg6: memref<1x1x128xf32, #tpu.memory_space<vmem>>, %arg7: memref<1x128xf32, #tpu.memory_space<vmem>>) attributes {dimension_semantics = [#tpu.dimension_semantics<parallel>, #tpu.dimension_semantics<arbitrary>], iteration_bounds = array<i64: 2, 1>, scalar_prefetch = 0 : i64, scratch_operands = 1 : i64, tpu.core_type = #tpu.core_type<tc>, window_params = [{transform_indices = @transform_0, window_bounds = array<i64: 1, 64, 128>}, {pipeline_mode = #tpu.pipeline_mode<synchronous>, transform_indices = @transform_1, window_bounds = array<i64: 128, 128>}, {pipeline_mode = #tpu.pipeline_mode<synchronous>, transform_indices = @transform_2, window_bounds = array<i64: 128, 128>}, {pipeline_mode = #tpu.pipeline_mode<synchronous>, transform_indices = @transform_3, window_bounds = array<i64: 8, 128>}, {transform_indices = @transform_4, window_bounds = array<i64: 1, 1, 128>}]} {
    %c0_i32 = arith.constant 0 : i32
    %0 = arith.cmpi eq, %arg1, %c0_i32 : i32
    %1 = arith.extui %0 : i1 to i32
    %c0_i32_0 = arith.constant 0 : i32
    %2 = arith.cmpi ne, %1, %c0_i32_0 : i32
    scf.if %2 {
      %cst_12 = arith.constant 0.000000e+00 : f32
      %15 = vector.broadcast %cst_12 : f32 to vector<1x128xf32>
      %c0_13 = arith.constant 0 : index
      %c0_14 = arith.constant 0 : index
      %16 = vector.load %arg7[%c0_13, %c0_14] : memref<1x128xf32, #tpu.memory_space<vmem>>, vector<1x128xf32>
      tpu.vector_store %arg7[%c0_13, %c0_14], %15 {strides = array<i32>} : memref<1x128xf32, #tpu.memory_space<vmem>>, vector<1x128xf32>,
    } else {
    }
    %c0 = arith.constant 0 : index
    %c0_1 = arith.constant 0 : index
    %c0_2 = arith.constant 0 : index
    %3 = vector.load %arg2[%c0, %c0_1, %c0_2] : memref<1x64x128xbf16, #tpu.memory_space<vmem>>, vector<1x64x128xbf16>
    %4 = vector.shape_cast %3 : vector<1x64x128xbf16> to vector<64x128xbf16>
    %c0_3 = arith.constant 0 : index
    %c0_4 = arith.constant 0 : index
    %5 = vector.load %arg3[%c0_3, %c0_4] : memref<128x128xbf16, #tpu.memory_space<vmem>>, vector<128x128xbf16>
    %cst = arith.constant dense<0.000000e+00> : vector<64x128xf32>
    %6 = tpu.matmul %4, %5, %cst {dimension_numbers = #tpu.dot_dimension_numbers<[1], [0], [0], [1], [0, 0, 1, 1], [], []>} : vector<64x128xbf16>, vector<128x128xbf16>, vector<64x128xf32> -> vector<64x128xf32>
    %c0_5 = arith.constant 0 : index
    %c0_6 = arith.constant 0 : index
    %7 = vector.load %arg7[%c0_5, %c0_6] : memref<1x128xf32, #tpu.memory_space<vmem>>, vector<1x128xf32>
    %cst_7 = arith.constant dense<0.000000e+00> : vector<128xf32>
    %8 = vector.multi_reduction <add>, %6, %cst_7 [0] : vector<64x128xf32> to vector<128xf32>
    %9 = vector.shape_cast %8 : vector<128xf32> to vector<1x128xf32>
    %10 = arith.addf %7, %9 : vector<1x128xf32>
    %c0_8 = arith.constant 0 : index
    %c0_9 = arith.constant 0 : index
    %11 = vector.load %arg7[%c0_8, %c0_9] : memref<1x128xf32, #tpu.memory_space<vmem>>, vector<1x128xf32>
    tpu.vector_store %arg7[%c0_8, %c0_9], %10 {strides = array<i32>} : memref<1x128xf32, #tpu.memory_space<vmem>>, vector<1x128xf32>,
    %c0_i32_10 = arith.constant 0 : i32
    %12 = arith.cmpi eq, %arg1, %c0_i32_10 : i32
    %13 = arith.extui %12 : i1 to i32
    %c0_i32_11 = arith.constant 0 : i32
    %14 = arith.cmpi ne, %13, %c0_i32_11 : i32
    scf.if %14 {
      %c0_12 = arith.constant 0 : index
      %c0_13 = arith.constant 0 : index
      %15 = vector.load %arg7[%c0_12, %c0_13] : memref<1x128xf32, #tpu.memory_space<vmem>>, vector<1x128xf32>
      %cst_14 = arith.constant 1.562500e-02 : f32
      %16 = vector.broadcast %cst_14 : f32 to vector<1x128xf32>
      %17 = arith.mulf %15, %16 : vector<1x128xf32>
      %c0_15 = arith.constant 0 : index
      %c0_16 = arith.constant 0 : index
      %18 = vector.load %arg5[%c0_15, %c0_16] : memref<8x128xf32, #tpu.memory_space<vmem>>, vector<1x128xf32>
      %19 = arith.addf %17, %18 : vector<1x128xf32>
      %c1 = arith.constant 1 : index
      %c0_17 = arith.constant 0 : index
      %20 = vector.load %arg5[%c1, %c0_17] : memref<8x128xf32, #tpu.memory_space<vmem>>, vector<1x128xf32>
      %21 = arith.addf %20, %19 : vector<1x128xf32>
      %22 = arith.truncf %21 : vector<1x128xf32> to vector<1x128xbf16>
      %c0_18 = arith.constant 0 : index
      %c0_19 = arith.constant 0 : index
      %23 = vector.load %arg4[%c0_18, %c0_19] : memref<128x128xbf16, #tpu.memory_space<vmem>>, vector<128x128xbf16>
      %cst_20 = arith.constant dense<0.000000e+00> : vector<1x128xf32>
      %24 = tpu.matmul %22, %23, %cst_20 {dimension_numbers = #tpu.dot_dimension_numbers<[1], [0], [0], [1], [0, 0, 1, 1], [], []>} : vector<1x128xbf16>, vector<128x128xbf16>, vector<1x128xf32> -> vector<1x128xf32>
      %c2 = arith.constant 2 : index
      %c0_21 = arith.constant 0 : index
      %25 = vector.load %arg5[%c2, %c0_21] : memref<8x128xf32, #tpu.memory_space<vmem>>, vector<1x128xf32>
      %26 = arith.addf %24, %25 : vector<1x128xf32>
      %27 = vector.shape_cast %26 : vector<1x128xf32> to vector<1x1x128xf32>
      %c0_22 = arith.constant 0 : index
      %c0_23 = arith.constant 0 : index
      %c0_24 = arith.constant 0 : index
      %28 = vector.load %arg6[%c0_22, %c0_23, %c0_24] : memref<1x1x128xf32, #tpu.memory_space<vmem>>, vector<1x1x128xf32>
      tpu.vector_store %arg6[%c0_22, %c0_23, %c0_24], %27 {strides = array<i32>} : memref<1x1x128xf32, #tpu.memory_space<vmem>>, vector<1x1x128xf32>,
    } else {
    }
    return
  }
  func.func @transform_0(%arg0: i32, %arg1: i32) -> (i32, i32, i32) {
    %c0_i32 = arith.constant 0 : i32
    %c0_i32_0 = arith.constant 0 : i32
    return %arg0, %arg1, %c0_i32 : i32, i32, i32
  }
  func.func @transform_1(%arg0: i32, %arg1: i32) -> (i32, i32) {
    %c0_i32 = arith.constant 0 : i32
    %c0_i32_0 = arith.constant 0 : i32
    %c0_i32_1 = arith.constant 0 : i32
    return %c0_i32, %c0_i32_0 : i32, i32
  }
  func.func @transform_2(%arg0: i32, %arg1: i32) -> (i32, i32) {
    %c0_i32 = arith.constant 0 : i32
    %c0_i32_0 = arith.constant 0 : i32
    %c0_i32_1 = arith.constant 0 : i32
    return %c0_i32, %c0_i32_0 : i32, i32
  }
  func.func @transform_3(%arg0: i32, %arg1: i32) -> (i32, i32) {
    %c0_i32 = arith.constant 0 : i32
    %c0_i32_0 = arith.constant 0 : i32
    %c0_i32_1 = arith.constant 0 : i32
    return %c0_i32, %c0_i32_0 : i32, i32
  }
  func.func @transform_4(%arg0: i32, %arg1: i32) -> (i32, i32, i32) {
    %c0_i32 = arith.constant 0 : i32
    %c0_i32_0 = arith.constant 0 : i32
    %c0_i32_1 = arith.constant 0 : i32
    return %arg0, %c0_i32, %c0_i32_0 : i32, i32, i32
  }
}

</mosaic_0001>

<bundles_post_ra>
// kernel: a_call__.2
= control target key start
LH: loop header
LB: loop body
LE: loop exit
PB: predicated region body
PF: predicated region fallthrough
CT: control target
= control target key end

     0   :  { %s612_s6 = smov 0   ;;  %s817_s0 = inlined_call_operand.vmem [shape: f32[2,12,12,12], index: 0, kind: input, shape index: {}]   ;;  %s818_s1 = inlined_call_operand.vmem [shape: bf16[2,16,16,16], index: 1, kind: output, shape index: {}]  }
   0x1 LB: > { %s510_s7 = sadd.s32 4294967295, %s598_s6   ;;  %p514_p0 = scmp.ge.s32.totalorder %s598_s6, 1  ;;  %s598_s6 = sphi %s612_s6, %s11_s6  }
   0x2   : > { %p87_p1 = scmp.lt.s32.totalorder %s598_s6, 3 }
   0x4   : > { %p88_p2 = pnand %p514_p0, %p87_p1 }
   0x5   : > { %p107_p3 = scmp.lt.s32.totalorder (!%p88_p2), %s510_s7, 1  ;;  %s601_s16 = smov (!%p88_p2), 2  }
   0x6   : > { %91 = sbr.rel (%p88_p2) target bundleno = 172 (0xac), region = 24 }
   0xb   : > { %s820_s7 = smov (!%p107_p3, %s510_s7), 1  ;;  %vm422_vm0 = vcmask 125952   ;;  %v600_v6 = vmov 0.0|0.0   ;;  %vm237_vm1 = vcmask 15360   ;;  %vm262_vm2 = vcmask 113664  }
   0xc   : > { %s521_s8 = smul.u32 192, %s820_s7  ;;  %s520_s9 = sshll.u32 %s820_s7, 7  ;;  %vm311_vm3 = vcmask 1041408   ;;  %vm384_vm4 = vcmask 1045504  }
   0xd   : > { %s631_s15 = scalar_lea.vmem %s818_s1, %s520_s9 }
   0xe   : > { %s623_s12 = scalar_lea.vmem %s817_s0, %s521_s8  ;;  %423 = vst.msk [vmem:[%s631_s15] sm:$0xf] %vm422_vm0, %v600_v6 }
   0xf   : > { %v121_v0 = vld [vmem:[%s623_s12 + $0x20] sm:$0xff]  ;;  %v122_v1 = vld [vmem:[%s623_s12 + $0x28] sm:$0xf]  ;;  %v123_v7 = vld [vmem:[%s623_s12 + $0x30] sm:$0xff]  ;;  %424 = vst.msk [vmem:[%s631_s15 + $0x4] sm:$0xf] %vm422_vm0, %v600_v6 }
  0x10   : > { %v117_v2 = vld [vmem:[%s623_s12] sm:$0xff]  ;;  %v542_v3 = vpack.i.bf16 %v122_v1, %v121_v0  ;;  %v118_v4 = vld [vmem:[%s623_s12 + $0x8] sm:$0xf]  ;;  %v124_v8 = vld [vmem:[%s623_s12 + $0x38] sm:$0xf] }
  0x11   : > { %v532_v5 = vpack.i.bf16 %v118_v4, %v117_v2  ;;  %v125_v9 = vld [vmem:[%s623_s12 + $0x40] sm:$0xff]  ;;  %v126_v10 = vld [vmem:[%s623_s12 + $0x48] sm:$0xf]  ;;  %v119_v11 = vld [vmem:[%s623_s12 + $0x10] sm:$0xff]  ;;  %v547_v14 = vpack.i.bf16 %v124_v8, %v123_v7  ;;  %425 = vst.msk [vmem:[%s631_s15 + $0x8] sm:$0xf] %vm422_vm0, %v600_v6 }
  0x12   : > { %543 = vrot.lane.b32.xlu1 %v542_v3, %s601_s16  ;;  %v120_v12 = vld [vmem:[%s623_s12 + $0x18] sm:$0xf]  ;;  %v552_v13 = vpack.i.bf16 %v126_v10, %v125_v9  ;;  %v127_v16 = vld [vmem:[%s623_s12 + $0x50] sm:$0xff]  ;;  %426 = vst.msk [vmem:[%s631_s15 + $0xc] sm:$0xf] %vm422_vm0, %v600_v6 }
  0x13   : > { %533 = vrot.lane.b32.xlu0 %v532_v5, %s601_s16  ;;  %v537_v15 = vpack.i.bf16 %v120_v12, %v119_v11  ;;  %v128_v17 = vld [vmem:[%s623_s12 + $0x58] sm:$0xf]  ;;  %451 = vst.msk [vmem:[%s631_s15 + $0x70] sm:$0xf] %vm422_vm0, %v600_v6  ;;  %v131_v19 = vld [vmem:[%s623_s12 + $0x70] sm:$0xff] }
  0x14   : > { %553 = vrot.lane.b32.xlu2 %v552_v13, %s601_s16  ;;  %v557_v18 = vpack.i.bf16 %v128_v17, %v127_v16  ;;  %452 = vst.msk [vmem:[%s631_s15 + $0x74] sm:$0xf] %vm422_vm0, %v600_v6  ;;  %v132_v20 = vld [vmem:[%s623_s12 + $0x78] sm:$0xf]  ;;  %v129_v21 = vld [vmem:[%s623_s12 + $0x60] sm:$0xff] }
  0x15   : > { %453 = vst.msk [vmem:[%s631_s15 + $0x78] sm:$0xf] %vm422_vm0, %v600_v6  ;;  %v130_v22 = vld [vmem:[%s623_s12 + $0x68] sm:$0xf]  ;;  %v567_v23 = vpack.i.bf16 %v132_v20, %v131_v19  ;;  %v133_v25 = vld [vmem:[%s623_s12 + $0x80] sm:$0xff]  ;;  %v135_v30 = vld [vmem:[%s623_s12 + $0x90] sm:$0xff] }
  0x16   : > { %454 = vst.msk [vmem:[%s631_s15 + $0x7c] sm:$0xf] %vm422_vm0, %v600_v6  ;;  %v562_v24 = vpack.i.bf16 %v130_v22, %v129_v21  ;;  %v134_v26 = vld [vmem:[%s623_s12 + $0x88] sm:$0xf]  ;;  %v137_v28 = vld [vmem:[%s623_s12 + $0xa0] sm:$0xff]  ;;  %v139_v34 = vld [vmem:[%s623_s12 + $0xb0] sm:$0xff] }
  0x17   : > { %v572_v27 = vpack.i.bf16 %v134_v26, %v133_v25  ;;  %v138_v29 = vld [vmem:[%s623_s12 + $0xa8] sm:$0xf]  ;;  %v136_v31 = vld [vmem:[%s623_s12 + $0x98] sm:$0xf] }
  0x18   : > { %v582_v32 = vpack.i.bf16 %v138_v29, %v137_v28  ;;  %v577_v33 = vpack.i.bf16 %v136_v31, %v135_v30  ;;  %v140_v35 = vld [vmem:[%s623_s12 + $0xb8] sm:$0xf] }
  0x19   : > { %v587_v36 = vpack.i.bf16 %v140_v35, %v139_v34 }
  0x1a   : > { %548 = vrot.lane.b32.xlu1 %v547_v14, %s601_s16 }
  0x1b   : > { %538 = vrot.lane.b32.xlu0 %v537_v15, %s601_s16 }
  0x1c   : > { %558 = vrot.lane.b32.xlu2 %v557_v18, %s601_s16 }
  0x22   : > { %568 = vrot.lane.b32.xlu1 %v567_v23, %s601_s16 }
  0x23   : > { %563 = vrot.lane.b32.xlu0 %v562_v24, %s601_s16 }
  0x24   : > { %573 = vrot.lane.b32.xlu2 %v572_v27, %s601_s16 }
  0x2a   : > { %583 = vrot.lane.b32.xlu1 %v582_v32, %s601_s16 }
  0x2b   : > { %578 = vrot.lane.b32.xlu0 %v577_v33, %s601_s16 }
  0x2c   : > { %588 = vrot.lane.b32.xlu2 %v587_v36, %s601_s16 }
  0x6e   : > { %v554_v37 = vpop.permute.xlu2 %553 }
  0x6f   : > { %v556_v38 = vunpack.i.h.bf16 %v554_v37  ;;  %v555_v39 = vunpack.i.l.bf16 %v554_v37 }
  0x71   : > { %v247_v40 = vsel %vm237_vm1, 0.0, %v556_v38  ;;  %v246_v41 = vsel %vm237_vm1, 0.0, %v555_v39 }
  0x72   : > { %v272_v42 = vsel %vm262_vm2, %v247_v40, 0.0  ;;  %v271_v43 = vsel %vm262_vm2, %v246_v41, 0.0 }
  0x73   : > { %v325_v44 = vrot.slane %v272_v42, 6  ;;  %v324_v45 = vrot.slane %v271_v43, 6 }
  0x75   : > { %v326_v46 = vsel %vm311_vm3, %v324_v45, %v325_v44  ;;  %v376_v47 = vsel %vm311_vm3, 0.0, %v324_v45 }
  0x76   : > { %v389_v48 = vsel %vm384_vm4, %v326_v46, 0.0  ;;  %v406_v49 = vpack.c.bf16 %v376_v47, %v376_v47  ;;  %v559_v50 = vpop.permute.xlu2 %558 }
  0x77   : > { %v407_v51 = vpack.c.bf16 %v389_v48, %v389_v48  ;;  %v561_v52 = vunpack.i.h.bf16 %v559_v50  ;;  %v560_v53 = vunpack.i.l.bf16 %v559_v50 }
  0x78   : > { %435 = vst.msk [vmem:[%s631_s15 + $0x30] sm:$0xf] %vm422_vm0, %v406_v49 }
  0x79   : > { %436 = vst.msk [vmem:[%s631_s15 + $0x34] sm:$0xf] %vm422_vm0, %v407_v51  ;;  %v249_v54 = vsel %vm237_vm1, 0.0, %v561_v52  ;;  %v248_v55 = vsel %vm237_vm1, 0.0, %v560_v53 }
  0x7a   : > { %v274_v56 = vsel %vm262_vm2, %v249_v54, 0.0  ;;  %v273_v57 = vsel %vm262_vm2, %v248_v55, 0.0 }
  0x7b   : > { %v328_v58 = vrot.slane %v274_v56, 6  ;;  %v327_v59 = vrot.slane %v273_v57, 6 }
  0x7d   : > { %v329_v60 = vsel %vm311_vm3, %v327_v59, %v328_v58  ;;  %v377_v61 = vsel %vm311_vm3, 0.0, %v327_v59 }
  0x7e   : > { %v390_v62 = vsel %vm384_vm4, %v329_v60, 0.0  ;;  %v408_v63 = vpack.c.bf16 %v377_v61, %v377_v61  ;;  %v574_v0 = vpop.permute.xlu2 %573 }
  0x7f   : > { %v409_v1 = vpack.c.bf16 %v390_v62, %v390_v62  ;;  %v576_v2 = vunpack.i.h.bf16 %v574_v0  ;;  %v575_v3 = vunpack.i.l.bf16 %v574_v0 }
  0x80   : > { %437 = vst.msk [vmem:[%s631_s15 + $0x38] sm:$0xf] %vm422_vm0, %v408_v63 }
  0x81   : > { %438 = vst.msk [vmem:[%s631_s15 + $0x3c] sm:$0xf] %vm422_vm0, %v409_v1  ;;  %v255_v4 = vsel %vm237_vm1, 0.0, %v576_v2  ;;  %v254_v5 = vsel %vm237_vm1, 0.0, %v575_v3 }
  0x82   : > { %v280_v7 = vsel %vm262_vm2, %v255_v4, 0.0  ;;  %v279_v8 = vsel %vm262_vm2, %v254_v5, 0.0 }
  0x83   : > { %v337_v12 = vrot.slane %v280_v7, 6  ;;  %v336_v13 = vrot.slane %v279_v8, 6 }
  0x84   : > { %v544_v6 = vpop.permute.xlu1 %543 }
  0x85   : > { %v546_v9 = vunpack.i.h.bf16 %v544_v6  ;;  %v545_v10 = vunpack.i.l.bf16 %v544_v6  ;;  %v534_v11 = vpop.permute.xlu0 %533  ;;  %v338_v18 = vsel %vm311_vm3, %v336_v13, %v337_v12  ;;  %v380_v19 = vsel %vm311_vm3, 0.0, %v336_v13 }
  0x86   : > { %v536_v14 = vunpack.i.h.bf16 %v534_v11  ;;  %v535_v15 = vunpack.i.l.bf16 %v534_v11  ;;  %v589_v24 = vpop.permute.xlu2 %588  ;;  %v393_v31 = vsel %vm384_vm4, %v338_v18, 0.0  ;;  %v414_v32 = vpack.c.bf16 %v380_v19, %v380_v19 }
  0x87   : > { %v243_v16 = vsel %vm237_vm1, 0.0, %v546_v9  ;;  %v242_v17 = vsel %vm237_vm1, 0.0, %v545_v10  ;;  %v415_v35 = vpack.c.bf16 %v393_v31, %v393_v31  ;;  %v591_v36 = vunpack.i.h.bf16 %v589_v24 }
  0x88   : > { %v268_v20 = vsel %vm262_vm2, %v243_v16, 0.0  ;;  %v267_v21 = vsel %vm262_vm2, %v242_v17, 0.0  ;;  %v239_v22 = vsel %vm237_vm1, 0.0, %v536_v14  ;;  %v238_v23 = vsel %vm237_vm1, 0.0, %v535_v15  ;;  %443 = vst.msk [vmem:[%s631_s15 + $0x50] sm:$0xf] %vm422_vm0, %v414_v32 }
  0x89   : > { %v319_v25 = vrot.slane %v268_v20, 6  ;;  %v318_v26 = vrot.slane %v267_v21, 6  ;;  %v264_v27 = vsel %vm262_vm2, %v239_v22, 0.0  ;;  %v263_v28 = vsel %vm262_vm2, %v238_v23, 0.0  ;;  %444 = vst.msk [vmem:[%s631_s15 + $0x54] sm:$0xf] %vm422_vm0, %v415_v35 }
  0x8a   : > { %v313_v29 = vrot.slane %v264_v27, 6  ;;  %v312_v30 = vrot.slane %v263_v28, 6  ;;  %v261_v52 = vsel %vm237_vm1, 0.0, %v591_v36  ;;  %v590_v53 = vunpack.i.l.bf16 %v589_v24 }
  0x8b   : > { %v320_v33 = vsel %vm311_vm3, %v318_v26, %v319_v25  ;;  %v374_v34 = vsel %vm311_vm3, 0.0, %v318_v26  ;;  %v286_v1 = vsel %vm262_vm2, %v261_v52, 0.0 }
  0x8c   : > { %v387_v37 = vsel %vm384_vm4, %v320_v33, 0.0  ;;  %v402_v38 = vpack.c.bf16 %v374_v34, %v374_v34  ;;  %v314_v39 = vsel %vm311_vm3, %v312_v30, %v313_v29  ;;  %v372_v40 = vsel %vm311_vm3, 0.0, %v312_v30  ;;  %v549_v41 = vpop.permute.xlu1 %548 }
  0x8d   : > { %v403_v42 = vpack.c.bf16 %v387_v37, %v387_v37  ;;  %v385_v43 = vsel %vm384_vm4, %v314_v39, 0.0  ;;  %v398_v44 = vpack.c.bf16 %v372_v40, %v372_v40  ;;  %v551_v45 = vunpack.i.h.bf16 %v549_v41  ;;  %v539_v46 = vpop.permute.xlu0 %538 }
  0x8e   : > { %431 = vst.msk [vmem:[%s631_s15 + $0x20] sm:$0xf] %vm422_vm0, %v402_v38  ;;  %v399_v47 = vpack.c.bf16 %v385_v43, %v385_v43  ;;  %v550_v48 = vunpack.i.l.bf16 %v549_v41  ;;  %v541_v49 = vunpack.i.h.bf16 %v539_v46  ;;  %v540_v50 = vunpack.i.l.bf16 %v539_v46 }
  0x8f   : > { %432 = vst.msk [vmem:[%s631_s15 + $0x24] sm:$0xf] %vm422_vm0, %v403_v42  ;;  %v245_v51 = vsel %vm237_vm1, 0.0, %v551_v45  ;;  %v260_v2 = vsel %vm237_vm1, 0.0, %v590_v53  ;;  %v346_v19 = vrot.slane %v286_v1, 6 }
  0x90   : > { %427 = vst.msk [vmem:[%s631_s15 + $0x10] sm:$0xf] %vm422_vm0, %v398_v44  ;;  %v270_v54 = vsel %vm262_vm2, %v245_v51, 0.0  ;;  %v244_v55 = vsel %vm237_vm1, 0.0, %v550_v48  ;;  %v241_v56 = vsel %vm237_vm1, 0.0, %v541_v49  ;;  %v240_v57 = vsel %vm237_vm1, 0.0, %v540_v50 }
  0x91   : > { %428 = vst.msk [vmem:[%s631_s15 + $0x14] sm:$0xf] %vm422_vm0, %v399_v47  ;;  %v322_v58 = vrot.slane %v270_v54, 6  ;;  %v269_v59 = vsel %vm262_vm2, %v244_v55, 0.0  ;;  %v266_v60 = vsel %vm262_vm2, %v241_v56, 0.0  ;;  %v265_v61 = vsel %vm262_vm2, %v240_v57, 0.0 }
  0x92   : > { %v321_v62 = vrot.slane %v269_v59, 6  ;;  %v316_v63 = vrot.slane %v266_v60, 6  ;;  %v315_v0 = vrot.slane %v265_v61, 6  ;;  %v285_v20 = vsel %vm262_vm2, %v260_v2, 0.0 }
  0x93   : > { %v345_v23 = vrot.slane %v285_v20, 6 }
  0x94   : > { %v323_v3 = vsel %vm311_vm3, %v321_v62, %v322_v58  ;;  %v375_v4 = vsel %vm311_vm3, 0.0, %v321_v62  ;;  %v317_v5 = vsel %vm311_vm3, %v315_v0, %v316_v63  ;;  %v373_v6 = vsel %vm311_vm3, 0.0, %v315_v0  ;;  %v569_v7 = vpop.permute.xlu1 %568 }
  0x95   : > { %v388_v8 = vsel %vm384_vm4, %v323_v3, 0.0  ;;  %v404_v9 = vpack.c.bf16 %v375_v4, %v375_v4  ;;  %v386_v10 = vsel %vm384_vm4, %v317_v5, 0.0  ;;  %v400_v11 = vpack.c.bf16 %v373_v6, %v373_v6  ;;  %v564_v12 = vpop.permute.xlu0 %563 }
  0x96   : > { %v405_v13 = vpack.c.bf16 %v388_v8, %v388_v8  ;;  %v401_v14 = vpack.c.bf16 %v386_v10, %v386_v10  ;;  %v571_v15 = vunpack.i.h.bf16 %v569_v7  ;;  %v570_v16 = vunpack.i.l.bf16 %v569_v7 }
  0x97   : > { %433 = vst.msk [vmem:[%s631_s15 + $0x28] sm:$0xf] %vm422_vm0, %v404_v9  ;;  %v566_v17 = vunpack.i.h.bf16 %v564_v12  ;;  %v565_v18 = vunpack.i.l.bf16 %v564_v12  ;;  %v347_v34 = vsel %vm311_vm3, %v345_v23, %v346_v19  ;;  %v383_v35 = vsel %vm311_vm3, 0.0, %v345_v23 }
  0x98   : > { %434 = vst.msk [vmem:[%s631_s15 + $0x2c] sm:$0xf] %vm422_vm0, %v405_v13  ;;  %v253_v21 = vsel %vm237_vm1, 0.0, %v571_v15  ;;  %v252_v22 = vsel %vm237_vm1, 0.0, %v570_v16  ;;  %v396_v38 = vsel %vm384_vm4, %v347_v34, 0.0  ;;  %v420_v39 = vpack.c.bf16 %v383_v35, %v383_v35 }
  0x99   : > { %429 = vst.msk [vmem:[%s631_s15 + $0x18] sm:$0xf] %vm422_vm0, %v400_v11  ;;  %v278_v24 = vsel %vm262_vm2, %v253_v21, 0.0  ;;  %v277_v25 = vsel %vm262_vm2, %v252_v22, 0.0  ;;  %v251_v26 = vsel %vm237_vm1, 0.0, %v566_v17  ;;  %v250_v27 = vsel %vm237_vm1, 0.0, %v565_v18 }
  0x9a   : > { %430 = vst.msk [vmem:[%s631_s15 + $0x1c] sm:$0xf] %vm422_vm0, %v401_v14  ;;  %v334_v28 = vrot.slane %v278_v24, 6  ;;  %v333_v29 = vrot.slane %v277_v25, 6  ;;  %v276_v30 = vsel %vm262_vm2, %v251_v26, 0.0  ;;  %v275_v31 = vsel %vm262_vm2, %v250_v27, 0.0 }
  0x9b   : > { %v331_v32 = vrot.slane %v276_v30, 6  ;;  %v330_v33 = vrot.slane %v275_v31, 6  ;;  %v421_v49 = vpack.c.bf16 %v396_v38, %v396_v38  ;;  %449 = vst.msk [vmem:[%s631_s15 + $0x68] sm:$0xf] %vm422_vm0, %v420_v39 }
  0x9c   : > { %v335_v36 = vsel %vm311_vm3, %v333_v29, %v334_v28  ;;  %v379_v37 = vsel %vm311_vm3, 0.0, %v333_v29  ;;  %v584_v40 = vpop.permute.xlu1 %583 }
  0x9d   : > { %v392_v41 = vsel %vm384_vm4, %v335_v36, 0.0  ;;  %v412_v42 = vpack.c.bf16 %v379_v37, %v379_v37  ;;  %v332_v43 = vsel %vm311_vm3, %v330_v33, %v331_v32  ;;  %v378_v44 = vsel %vm311_vm3, 0.0, %v330_v33  ;;  %v579_v45 = vpop.permute.xlu0 %578  ;;  %450 = vst.msk [vmem:[%s631_s15 + $0x6c] sm:$0xf] %vm422_vm0, %v421_v49 }
  0x9e   : > { %v413_v46 = vpack.c.bf16 %v392_v41, %v392_v41  ;;  %v391_v47 = vsel %vm384_vm4, %v332_v43, 0.0  ;;  %v410_v48 = vpack.c.bf16 %v378_v44, %v378_v44  ;;  %v586_v51 = vunpack.i.h.bf16 %v584_v40 }
  0x9f   : > { %441 = vst.msk [vmem:[%s631_s15 + $0x48] sm:$0xf] %vm422_vm0, %v412_v42  ;;  %v411_v50 = vpack.c.bf16 %v391_v47, %v391_v47  ;;  %v585_v52 = vunpack.i.l.bf16 %v584_v40  ;;  %v581_v53 = vunpack.i.h.bf16 %v579_v45  ;;  %v580_v54 = vunpack.i.l.bf16 %v579_v45 }
  0xa0   : > { %442 = vst.msk [vmem:[%s631_s15 + $0x4c] sm:$0xf] %vm422_vm0, %v413_v46  ;;  %v259_v55 = vsel %vm237_vm1, 0.0, %v586_v51 }
  0xa1   : > { %439 = vst.msk [vmem:[%s631_s15 + $0x40] sm:$0xf] %vm422_vm0, %v410_v48  ;;  %v258_v56 = vsel %vm237_vm1, 0.0, %v585_v52  ;;  %v257_v57 = vsel %vm237_vm1, 0.0, %v581_v53  ;;  %v284_v58 = vsel %vm262_vm2, %v259_v55, 0.0  ;;  %v256_v61 = vsel %vm237_vm1, 0.0, %v580_v54 }
  0xa2   : > { %440 = vst.msk [vmem:[%s631_s15 + $0x44] sm:$0xf] %vm422_vm0, %v411_v50  ;;  %v283_v59 = vsel %vm262_vm2, %v258_v56, 0.0  ;;  %v282_v60 = vsel %vm262_vm2, %v257_v57, 0.0  ;;  %v343_v62 = vrot.slane %v284_v58, 6  ;;  %v281_v1 = vsel %vm262_vm2, %v256_v61, 0.0 }
  0xa3   : > { %v342_v63 = vrot.slane %v283_v59, 6  ;;  %v340_v0 = vrot.slane %v282_v60, 6  ;;  %v339_v2 = vrot.slane %v281_v1, 6 }
  0xa5   : > { %v344_v3 = vsel %vm311_vm3, %v342_v63, %v343_v62  ;;  %v382_v4 = vsel %vm311_vm3, 0.0, %v342_v63  ;;  %v341_v7 = vsel %vm311_vm3, %v339_v2, %v340_v0  ;;  %v381_v8 = vsel %vm311_vm3, 0.0, %v339_v2 }
  0xa6   : > { %v395_v5 = vsel %vm384_vm4, %v344_v3, 0.0  ;;  %v418_v6 = vpack.c.bf16 %v382_v4, %v382_v4  ;;  %v394_v10 = vsel %vm384_vm4, %v341_v7, 0.0  ;;  %v416_v11 = vpack.c.bf16 %v381_v8, %v381_v8 }
  0xa7   : > { %v419_v9 = vpack.c.bf16 %v395_v5, %v395_v5  ;;  %v417_v12 = vpack.c.bf16 %v394_v10, %v394_v10 }
  0xa8   : > { %447 = vst.msk [vmem:[%s631_s15 + $0x60] sm:$0xf] %vm422_vm0, %v418_v6 }
  0xa9   : > { %448 = vst.msk [vmem:[%s631_s15 + $0x64] sm:$0xf] %vm422_vm0, %v419_v9 }
  0xaa   : > { %445 = vst.msk [vmem:[%s631_s15 + $0x58] sm:$0xf] %vm422_vm0, %v416_v11 }
  0xab   : > { %446 = vst.msk [vmem:[%s631_s15 + $0x5c] sm:$0xf] %vm422_vm0, %v417_v12 }
  0xac PF: > { %s11_s6 = sadd.s32 1, %s598_s6  }
  0xad   : > { %p8_p4 = scmp.ge.s32.totalorder %s11_s6, 4  }
  0xaf   :  { %10 = sbr.rel (!%p8_p4) target bundleno = 1 (0x1), region = 54 }

// kernel: a_call__.3
= control target key start
LH: loop header
LB: loop body
LE: loop exit
PB: predicated region body
PF: predicated region fallthrough
CT: control target
= control target key end

     0   :  { %9 = vsyncpa [#allocation4], 0  ;;  %s982_s0 = inlined_call_operand.vmem [shape: bf16[2,64,128], index: 0, kind: input, shape index: {}]   ;;  %s983_s1 = inlined_call_operand.vmem [shape: bf16[128,128], index: 1, kind: input, shape index: {}]   ;;  %s984_s2 = inlined_call_operand.vmem [shape: bf16[128,128], index: 2, kind: input, shape index: {}]   ;;  %s985_s3 = inlined_call_operand.vmem [shape: f32[8,128], index: 3, kind: input, shape index: {}]   ;;  %s986_s4 = inlined_call_operand.hbm [shape: f32[2,1,128], index: 4, kind: output, shape index: {}]  }
   0x1   :  { %11 = vsyncpa [#allocation4 + $0x1], 0  ;;  %s828_s15 = smov 0   ;;  %s830_s16 = smov 0  }
   0x2   :  { %s832_s17 = smov 0   ;;  %s834_s18 = smov 0  }
   0x3   :  { %s836_s19 = smov 0   ;;  %s838_s20 = smov 0  }
   0x4 LB: > { %s540_s21 = sadd.s32 4294967295, %s800_s20   ;;  %s541_s22 = sadd.s32 4294967294, %s800_s20   ;;  %s800_s20 = sphi %s838_s20, %s17_s20   ;;  %s796_s19 = sphi %s836_s19, %s993_s19   ;;  %s792_s18 = sphi %s834_s18, %s992_s18   ;;  %s788_s17 = sphi %s832_s17, %s991_s17   ;;  %s784_s16 = sphi %s830_s16, %s990_s16   ;;  %s780_s15 = sphi %s828_s15, %s989_s15  }
   0x5   : > { %s29_s23 = sadd.s32 1, %s796_s19  ;;  %s127_s24 = sadd.s32 1, %s788_s17 }
   0x6   : > { %p31_p0 = scmp.ge.s32.totalorder %s29_s23, 2  ;;  %p137_p1 = scmp.ne.s32.totalorder %s788_s17, %s784_s16 }
   0x7   : > { %p138_p2 = scmp.eq.s32.totalorder %s540_s21, 1  ;;  %p143_p3 = scmp.ne.s32.totalorder %s784_s16, %s780_s15 }
   0x8   : > { %s995_s23 = smov (%p31_p0, %s29_s23), 0  ;;  %p144_p5 = scmp.eq.s32.totalorder %s541_s22, 1 }
   0x9   : > { %p868_p4 = por %p138_p2, %p137_p1  ;;  %s124_s26 = ssub.s32 %s796_s19, %s995_s23 }
   0xa   : > { %p544_p6 = scmp.ge.s32.totalorder %s800_s20, 1  ;;  %p125_p7 = scmp.eq.s32.totalorder %s124_s26, 0 }
   0xb   : > { %p875_p8 = por %p144_p5, %p143_p3  ;;  %p184_p9 = scmp.lt.s32.totalorder %s800_s20, 3 }
   0xc   : > { %s881_s28 = scalar_select %p125_p7, %s788_s17, %s127_s24  }
   0xd   : > { %p185_p10 = pnand %p544_p6, %p184_p9 }
   0xe   : > { %p214_p11 = scmp.lt.s32.totalorder (!%p185_p10), %s792_s18, 1  ;;  %s211_s12 = sand.u32 (!%p185_p10), 1, %s784_s16  }
   0xf   : > { %188 = sbr.rel (%p185_p10) target bundleno = 374 (0x176), region = 36  ;;  %s459_s5 = scalar_lea.sflag (!%p185_p10), [#allocation4], %s211_s12 }
  0x10   : > { %s742_s9 = scalar_lea.hbm (!%p185_p10), %s986_s4, 2 }
  0x14   : > { %v641_v0 = vld [vmem:[%s983_s1 + $0x38] sm:$0xff]  ;;  %v640_v1 = vld [vmem:[%s983_s1 + $0x30] sm:$0xff]  ;;  %v639_v2 = vld [vmem:[%s983_s1 + $0x28] sm:$0xff]  ;;  %s215_s21 = scalar_select %p214_p11, %s792_s18, 1  ;;  %v802_v12 = vmov 0.0  }
  0x15   : > { %650 = vmatpush.bf16.msra.mxu2 %v641_v0  ;;  %651 = vmatpush.bf16.msra.mxu3 %v641_v0  ;;  %v638_v3 = vld [vmem:[%s983_s1 + $0x20] sm:$0xff]  ;;  %v637_v4 = vld [vmem:[%s983_s1 + $0x18] sm:$0xff]  ;;  %v636_v5 = vld [vmem:[%s983_s1 + $0x10] sm:$0xff]  ;;  %227 = vst [vmem:[#allocation2] sm:$0x1] %v802_v12 }
  0x16   : > { %324 = vmatpush.bf16.msra.mxu0 %v641_v0  ;;  %v635_v6 = vld [vmem:[%s983_s1 + $0x8] sm:$0xff]  ;;  %s629_s26 = sshll.u32 %s215_s21, 5  ;;  %v634_v7 = vld [vmem:[%s983_s1] sm:$0xff]  ;;  %v649_v13 = vld [vmem:[%s984_s2 + $0x38] sm:$0xff]  ;;  %s467_s21 = scalar_lea.hbm %s986_s4, %s792_s18 }
  0x17   : > { %s221_s7 = scalar_lea.vmem %s982_s0, %s629_s26  ;;  %444 = vmatpush.bf16.msra.mxu1 %v649_v13  ;;  %v648_v15 = vld [vmem:[%s984_s2 + $0x30] sm:$0xff]  ;;  %v647_v18 = vld [vmem:[%s984_s2 + $0x28] sm:$0xff]  ;;  %v646_v20 = vld [vmem:[%s984_s2 + $0x20] sm:$0xff]  ;;  %s212_s26 = scalar_lea.vmem [#allocation3], %s211_s12 }
  0x18   : > { %v631_v8 = vld [vmem:[%s221_s7 + $0x8] sm:$0xff]  ;;  %v632_v9 = vld [vmem:[%s221_s7 + $0x10] sm:$0xff]  ;;  %v630_v10 = vld [vmem:[%s221_s7] sm:$0xff]  ;;  %s469_s29 = sshll.u32 %s212_s26, 4  ;;  %s471_s30 = sshll.u32 %s467_s21, 4  ;;  %s470_s29 = int_to_ptr.vmem [resolvable:$true] %s469_s29  ;;  %s472_s30 = int_to_ptr.hbm [resolvable:$true] %s471_s30 }
  0x19   : > { %652 = vmatpush.bf16.msra.mxu2 %v640_v1  ;;  %653 = vmatpush.bf16.msra.mxu3 %v640_v1  ;;  %v633_v11 = vld [vmem:[%s221_s7 + $0x18] sm:$0xff]  ;;  %v644_v26 = vld [vmem:[%s984_s2 + $0x10] sm:$0xff]  ;;  %v643_v28 = vld [vmem:[%s984_s2 + $0x8] sm:$0xff]  ;;  %s736_s6 = sshra.s32 %s472_s30, 4  ;;  %s737_s6 = int_to_ptr.hbm [resolvable:$true] %s736_s6 }
  0x1a   : > { %325 = vmatpush.bf16.msra.mxu0 %v640_v1  ;;  %v645_v23 = vld [vmem:[%s984_s2 + $0x18] sm:$0xff]  ;;  %v642_v31 = vld [vmem:[%s984_s2] sm:$0xff]  ;;  %s738_s7 = scalar_lea.hbm %s737_s6, 1  ;;  %p743_p1 = scmp.lt.s32.totalorder %s737_s6, %s986_s4 }
  0x1b   : > { %445 = vmatpush.bf16.msra.mxu1 %v648_v15  ;;  %v374_v45 = vld [vmem:[%s985_s3] sm:$0x1]  ;;  %v376_v47 = vld [vmem:[%s985_s3 + $0x1] sm:$0x1]  ;;  %v395_v51 = vld [vmem:[%s985_s3 + $0x2] sm:$0x1]  ;;  %p739_p12 = scmp.ne.s32.totalorder %s737_s6, %s738_s7  ;;  %p744_p2 = scmp.lt.s32.totalorder %s742_s9, %s738_s7 }
  0x1c   : > { %v353_v41 = vld [vmem:[#allocation2] sm:$0x1] }
  0x1d   : > { %654 = vmatpush.bf16.msra.mxu2 %v639_v2  ;;  %655 = vmatpush.bf16.msra.mxu3 %v639_v2  ;;  %p740_p13 = pnand %p739_p12, %p868_p4  ;;  %p745_p3 = por %p744_p2, %p743_p1 }
  0x1e   : > { %326 = vmatpush.bf16.msra.mxu0 %v639_v2 }
  0x1f   : > { %446 = vmatpush.bf16.msra.mxu1 %v647_v18  ;;  %p741_p0 = pneg %p740_p13 }
  0x21   : > { %656 = vmatpush.bf16.msra.mxu2 %v638_v3  ;;  %657 = vmatpush.bf16.msra.mxu3 %v638_v3  ;;  %p746_p5 = pnand %p745_p3, %p741_p0 }
  0x22   : > { %327 = vmatpush.bf16.msra.mxu0 %v638_v3 }
  0x23   : > { %447 = vmatpush.bf16.msra.mxu1 %v646_v20 }
  0x25   : > { %658 = vmatpush.bf16.msra.mxu2 %v637_v4  ;;  %659 = vmatpush.bf16.msra.mxu3 %v637_v4 }
  0x26   : > { %328 = vmatpush.bf16.msra.mxu0 %v637_v4 }
  0x27   : > { %448 = vmatpush.bf16.msra.mxu1 %v645_v23 }
  0x29   : > { %660 = vmatpush.bf16.msra.mxu2 %v636_v5  ;;  %661 = vmatpush.bf16.msra.mxu3 %v636_v5 }
  0x2a   : > { %329 = vmatpush.bf16.msra.mxu0 %v636_v5 }
  0x2b   : > { %449 = vmatpush.bf16.msra.mxu1 %v644_v26 }
  0x2d   : > { %662 = vmatpush.bf16.msra.mxu2 %v635_v6  ;;  %663 = vmatpush.bf16.msra.mxu3 %v635_v6 }
  0x2e   : > { %330 = vmatpush.bf16.msra.mxu0 %v635_v6 }
  0x2f   : > { %450 = vmatpush.bf16.msra.mxu1 %v643_v28 }
  0x31   : > { %664 = vmatpush.bf16.msra.mxu2 %v634_v7  ;;  %665 = vmatpush.bf16.msra.mxu3 %v634_v7 }
  0x32   : > { %331 = vmatpush.bf16.msra.mxu0 %v634_v7 }
  0x33   : > { %451 = vmatpush.bf16.msra.mxu1 %v642_v31 }
  0x34   : > { %337 = vmatmul.bf16.vlgmr.msra.gmra.mxu2 %v631_v8  ;;  %342 = vmatmul.bf16.vlgmr.msra.gmra.mxu3 %v632_v9 }
  0x35   : > { %332 = vmatmul.bf16.vlgmr.msra.gmra.mxu0 %v630_v10 }
  0x44   : > { %347 = vmatmul.bf16.gmra.mxu3 %v633_v11 }
  0xb2   : > { %v333_v14 = vpop.f32.mrf.mxu0 }
  0xb7   : > { %v338_v16 = vpop.f32.mrf.mxu2  ;;  %v343_v17 = vpop.f32.mrf.mxu3 }
  0xba   : > { %v335_v19 = vpop.f32.mrf.mxu0 }
  0xbb   : > { %v354_v21 = vadd.f32 %v335_v19, %v333_v14 }
  0xbd   : > { %v355_v24 = vadd.f32 %v354_v21, %v338_v16 }
  0xbf   : > { %v345_v22 = vpop.f32.mrf.mxu3  ;;  %v340_v25 = vpop.f32.mrf.mxu2 }
  0xc0   : > { %v356_v27 = vadd.f32 %v355_v24, %v340_v25 }
  0xc2   : > { %v357_v30 = vadd.f32 %v356_v27, %v343_v17 }
  0xc4   : > { %v358_v32 = vadd.f32 %v357_v30, %v345_v22 }
  0xc7   : > { %v348_v29 = vpop.f32.mrf.mxu3 }
  0xc8   : > { %v359_v33 = vadd.f32 %v358_v32, %v348_v29 }
  0xcf   : > { %v350_v34 = vpop.f32.mrf.mxu3 }
  0xd0   : > { %v360_v35 = vadd.f32 %v359_v33, %v350_v34 }
  0xd2   : > { %v361_v36 = vrot.slane %v360_v35, 4 }
  0xd4   : > { %v362_v37 = vadd.f32 %v361_v36, %v360_v35 }
  0xd6   : > { %v363_v38 = vrot.slane %v362_v37, 2 }
  0xd8   : > { %v364_v39 = vadd.f32 %v363_v38, %v362_v37 }
  0xda   : > { %v365_v40 = vrot.slane %v364_v39, 1 }
  0xdc   : > { %v366_v42 = vadd.f32 %v365_v40, %v364_v39 }
  0xde   : > { %v367_v43 = vadd.f32 %v366_v42, %v353_v41 }
  0xe0   : > { %368 = vst [vmem:[#allocation2] sm:$0x1] %v367_v43 }
  0xe7   : > { %v372_v44 = vld [vmem:[#allocation2] sm:$0x1] }
  0xe8   : > { %v373_v46 = vmul.f32 0.015625, %v372_v44 }
  0xea   : > { %v375_v48 = vadd.f32 %v374_v45, %v373_v46 }
  0xec   : > { %v377_v49 = vadd.f32 %v376_v47, %v375_v48 }
  0xee   : > { %v378_v50 = vpack.c.bf16 %v377_v49, %v377_v49 }
  0xf0   : > { %452 = vmatmul.bf16.vlgmr.msra.gmra.mxu1 %v378_v50 }
 0x16d   : > { %v453_v52 = vpop.f32.mrf.mxu1 }
 0x16e   : > { %v454_v53 = vadd.f32 %v453_v52, %v395_v51 }
 0x170   : > { %457 = vst [vmem:[%s212_s26] sm:$0x1] %v454_v53 }
 0x171   : > { %749 = shalt.err (!%p746_p5)
}
 0x172   : > { %666 = dma.vmem_to_hbm [thread:$0]  (%p868_p4), %s470_s29, 16, %s472_s30, %s459_s5  }
 0x175   : > { %v455_v54 = vpop.f32.mrf.mxu1 }
 0x176 PF: > { %p672_p6 = scmp.ge.s32.totalorder %s800_s20, 2  ;;  %s483_s12 = sand.u32 1, %s780_s15  }
 0x177   : > { %s484_s13 = scalar_lea.sflag [#allocation4], %s483_s12 }
 0x178   : > { %p669_p7 = pnand %p672_p6, %p875_p8 }
 0x17a   : > { %p670_p9 = pneg %p669_p7 }
 0x17c   : > { %775 = dma.done.wait (%p670_p9), %s484_s13, 16  }
 0x17d   : > { %777 = vsyncadd (%p670_p9), %s484_s13, 4294967280  ;;  %s17_s20 = sadd.s32 1, %s800_s20   ;;  %s989_s15 = smov %s784_s16 }
 0x17e   : > { %p14_p10 = scmp.ge.s32.totalorder %s17_s20, 4   ;;  %s990_s16 = smov %s788_s17 }
 0x17f   : > { %s991_s17 = smov %s881_s28  ;;  %s992_s18 = smov %s796_s19 }
 0x180   : > { %s993_s19 = smov %s995_s23  ;;  %16 = sbr.rel (!%p14_p10) target bundleno = 4 (0x4), region = 79 }
 0x185   :  { %489 = vsyncpa [#allocation4], 1 }
 0x186   :  { %491 = vsyncpa [#allocation4 + $0x1], 1 }

</bundles_post_ra>
